<compile_context>
chip_gen: v5e
topology: v5e:2x2
jax: 0.10.0
libtpu: 0.0.40
codegen_flags: <defaults>
</compile_context>

<pallas_src>
import numpy as np
import jax
import jax.numpy as jnp
from jax import lax
from jax.experimental import pallas as pl
from jax.experimental.pallas import tpu as pltpu


def block_forward(x_nchw, w, b, gamma, beta, scale_shift=None, groups=8,
                  out_dtype=jnp.float32):
    """Pallas forward of `Block`. x_nchw: (N, Cin, H, W) float32. Returns NCHW."""
    N, Cin, H, W = x_nchw.shape
    Cout = w.shape[0]
    assert Cout % groups == 0
    cpg = Cout // groups
    HW = H * W                     # lane axis of the output; multiple of 128 => unmasked stores
    Lw = (H + 2) * W               # vertically padded image, flattened row-major

    eps_w = 1e-5                   # x is float32 -> weight-standardization eps (torch rule)
    eps_gn = 1e-5                  # nn.GroupNorm default

    # ---------------- wrapper glue (cheap; no 9x im2col, no transposes) --------------
    # Weight standardization hoisted out of the kernel (grid-invariant), laid out
    # dy-major with dx folded into the contraction: (3, Cout, 3*Cin), bf16 for the MXU.
    w32 = w.astype(jnp.float32)
    wm = jnp.mean(w32, axis=(1, 2, 3), keepdims=True)
    wv = jnp.mean(w32 * w32, axis=(1, 2, 3), keepdims=True) - wm * wm    # unbiased=False
    wn = (w32 - wm) * lax.rsqrt(wv + eps_w)
    # w3[dy, o, dx*Cin + i] = wn[o, i, dy, dx]
    w3 = jnp.transpose(wn, (2, 0, 3, 1)).reshape(3, Cout, 3 * Cin).astype(jnp.bfloat16)

    # Input: pad H by 1 each side, then build the three dx-shifted copies with the
    # horizontal zero-padding baked in, stacked dx-major on the channel axis and
    # flattened: xs[n, dx*Cin + i, r*W + c] = P[n, i, r, c + dx]  (P = fully padded).
    # Tap (dy, dx) of the conv is then the contiguous lane slice [dy*W : dy*W + HW)
    # of channel block dx -> only 3 lane slices per image, all at offsets dy*W.
    xv = jnp.pad(x_nchw.astype(jnp.float32), ((0, 0), (0, 0), (1, 1), (0, 0)))  # (N,Cin,H+2,W)
    s0 = jnp.pad(xv, ((0, 0), (0, 0), (0, 0), (1, 0)))[..., :W]   # dx=0: shift right, zero col 0
    s2 = jnp.pad(xv, ((0, 0), (0, 0), (0, 0), (0, 1)))[..., 1:]   # dx=2: shift left, zero col W-1
    xs = jnp.stack([s0, xv, s2], axis=1).reshape(N, 3 * Cin, Lw).astype(jnp.bfloat16)

    # Group-membership matrices (hoisted; used for the tiny stats matmuls).
    ch = jnp.arange(Cout, dtype=jnp.int32)
    gr = jnp.arange(groups, dtype=jnp.int32)
    memb = (ch[:, None] // cpg == gr[None, :]).astype(jnp.float32)        # (Cout, groups)
    memb_t = memb.T                                                        # (groups, Cout)

    # Batch-invariant per-channel columns fused into one input: [bias, gamma, beta].
    pv = jnp.stack([b, gamma, beta]).astype(jnp.float32).reshape(3, Cout, 1)

    if scale_shift is not None:
        scale, shift = scale_shift                                         # (N, Cout, 1, 1)
        sp1 = (scale.reshape(N, Cout, 1) + 1.0).astype(jnp.float32)
        sh = shift.reshape(N, Cout, 1).astype(jnp.float32)
    else:
        sp1 = jnp.ones((N, Cout, 1), jnp.float32)
        sh = jnp.zeros((N, Cout, 1), jnp.float32)
    scsh = jnp.stack([sp1, sh], axis=1)                                    # (N, 2, Cout, 1)

    inv_cnt = 1.0 / float(HW * cpg)

    # Batch fold: as many images per grid step as fit a modest VMEM budget (amortizes
    # per-step overhead and keeps the MXU fed at small shapes; NB -> 1 at big shapes).
    per_img_bytes = 2 * (3 * Cin * Lw * 2) + 2 * (Cout * HW * 4) + Cout * HW * 4
    NB = 1
    for cand in range(1, N + 1):
        if N % cand == 0 and cand * per_img_bytes <= (8 << 20):
            NB = cand
    vmem_limit = int(min(64 << 20, max(16 << 20, 4 * NB * per_img_bytes)))

    # ---------------- Pallas kernel: NB batch elements per grid step -----------------
    def kernel(x_ref, w_ref, memb_ref, membt_ref, pv_ref, ss_ref, o_ref, acc_ref):
        memb_m = memb_ref[...]                    # (Cout, groups) f32
        membt_m = membt_ref[...]                  # (groups, Cout) f32
        bias = pv_ref[0]                          # (Cout, 1) f32
        gam = pv_ref[1]
        bet = pv_ref[2]

        for j in range(NB):
            # 3x3 conv as 3 accumulated bf16 MXU matmuls (dx stacked into K = 3*Cin);
            # HW on the lane axis, slice offsets dy*W (aligned when W % 128 == 0).
            acc_ref[...] = jnp.dot(w_ref[0], x_ref[j, :, pl.ds(0, HW)],
                                   preferred_element_type=jnp.float32)
            for dy in (1, 2):
                acc_ref[...] += jnp.dot(w_ref[dy], x_ref[j, :, pl.ds(dy * W, HW)],
                                        preferred_element_type=jnp.float32)
            acc = acc_ref[...]                    # (Cout, HW) f32

            # GroupNorm statistics with the conv bias folded in analytically
            # (no full (Cout, HW) bias-add pass).  Columns only -> no lane-axis
            # concatenates; 4 tiny membership matmuls do the group reduce/broadcast.
            s_m = jnp.sum(acc, axis=1, keepdims=True)                 # (Cout, 1)
            ss_m = jnp.sum(acc * acc, axis=1, keepdims=True)          # (Cout, 1)
            s = s_m + float(HW) * bias
            ssq = ss_m + 2.0 * bias * s_m + float(HW) * (bias * bias)
            gs = jnp.dot(membt_m, s, preferred_element_type=jnp.float32)    # (groups, 1)
            gss = jnp.dot(membt_m, ssq, preferred_element_type=jnp.float32)
            gmean = gs * inv_cnt
            ginv = lax.rsqrt(gss * inv_cnt - gmean * gmean + eps_gn)
            mean_c = jnp.dot(memb_m, gmean, preferred_element_type=jnp.float32)  # (Cout, 1)
            inv_c = jnp.dot(memb_m, ginv, preferred_element_type=jnp.float32)

            # Fold GroupNorm affine + scale_shift (+ conv bias) into one FMA:
            # y = acc * A + B.
            sp1v = ss_ref[j, 0]                    # (Cout, 1)  scale + 1
            shv = ss_ref[j, 1]                     # (Cout, 1)  shift
            ig = inv_c * gam
            A = ig * sp1v
            B = (bet + (bias - mean_c) * ig) * sp1v + shv
            y = acc * A + B

            # SiLU: y * sigmoid(y); exp -> EUP, divide -> EUP approximate reciprocal.
            y = y * pl.reciprocal(1.0 + jnp.exp(-y), approx=True)
            o_ref[j] = y.astype(o_ref.dtype)

    cost = pl.CostEstimate(
        flops=2 * 9 * N * Cout * Cin * HW + 6 * N * Cout * HW,
        transcendentals=N * Cout * HW,
        bytes_accessed=int(xs.size * 2 + w3.size * 2 + N * Cout * HW * 4
                           + memb.size * 4 + memb_t.size * 4
                           + pv.size * 4 + scsh.size * 4),
    )

    out = pl.pallas_call(
        kernel,
        out_shape=jax.ShapeDtypeStruct((N, Cout, HW), out_dtype),
        grid_spec=pltpu.PrefetchScalarGridSpec(
            num_scalar_prefetch=0,
            grid=(N // NB,),
            in_specs=[
                pl.BlockSpec((NB, 3 * Cin, Lw), lambda n: (n, 0, 0)),
                pl.BlockSpec((3, Cout, 3 * Cin), lambda n: (0, 0, 0)),
                pl.BlockSpec((Cout, groups), lambda n: (0, 0)),
                pl.BlockSpec((groups, Cout), lambda n: (0, 0)),
                pl.BlockSpec((3, Cout, 1), lambda n: (0, 0, 0)),
                pl.BlockSpec((NB, 2, Cout, 1), lambda n: (n, 0, 0, 0)),
            ],
            out_specs=pl.BlockSpec((NB, Cout, HW), lambda n: (n, 0, 0)),
            scratch_shapes=[pltpu.VMEM((Cout, HW), jnp.float32)],
        ),
        compiler_params=pltpu.CompilerParams(
            dimension_semantics=("parallel",),
            vmem_limit_bytes=vmem_limit,
        ),
        cost_estimate=cost,
    )(xs, w3, memb, memb_t, pv, scsh)

    # Output is already channel-major: free reshape back to NCHW (no transpose).
    return out.reshape(N, Cout, H, W)


def ref_block(x, w, b, gamma, beta, scale_shift=None, groups=8):
    """Pure-JAX f32 reference mirroring the PyTorch forward exactly."""
    eps = 1e-5
    mean = jnp.mean(w, axis=(1, 2, 3), keepdims=True)
    var = jnp.mean(w * w, axis=(1, 2, 3), keepdims=True) - mean * mean   # unbiased=False
    wn = (w - mean) * lax.rsqrt(var + eps)
    y = lax.conv_general_dilated(
        x, wn, window_strides=(1, 1), padding=((1, 1), (1, 1)),
        dimension_numbers=('NCHW', 'OIHW', 'NCHW'),
        precision=lax.Precision.HIGHEST) + b[None, :, None, None]
    N, C, H, W = y.shape
    cpg = C // groups
    yg = y.reshape(N, groups, cpg, H, W)
    m = jnp.mean(yg, axis=(2, 3, 4), keepdims=True)
    v = jnp.mean(yg * yg, axis=(2, 3, 4), keepdims=True) - m * m
    yn = (yg - m) * lax.rsqrt(v + 1e-5)
    yn = yn.reshape(N, C, H, W) * gamma[None, :, None, None] + beta[None, :, None, None]
    if scale_shift is not None:
        scale, shift = scale_shift
        yn = yn * (scale + 1.0) + shift
    return yn * jax.nn.sigmoid(yn)


if __name__ == "__main__":
    # Small shapes consistent with the module: dim=4 -> dim_out=16, groups=8.
    N, Cin, Cout, H, W, G = 2, 4, 16, 16, 16, 8

    key = jax.random.PRNGKey(0)
    ks = jax.random.split(key, 7)
    x = jax.random.normal(ks[0], (N, Cin, H, W), jnp.float32)
    w = 0.1 * jax.random.normal(ks[1], (Cout, Cin, 3, 3), jnp.float32)
    b = 0.05 * jax.random.normal(ks[2], (Cout,), jnp.float32)
    gamma = 1.0 + 0.1 * jax.random.normal(ks[3], (Cout,), jnp.float32)
    beta = 0.1 * jax.random.normal(ks[4], (Cout,), jnp.float32)
    scale = 0.1 * jax.random.normal(ks[5], (N, Cout, 1, 1), jnp.float32)
    shift = 0.1 * jax.random.normal(ks[6], (N, Cout, 1, 1), jnp.float32)

    # Tolerance accounts for bf16 MXU operands (f32 accumulation) vs the pure-f32 ref.
    TOL = 3e-2

    # forward without scale_shift
    out = jax.block_until_ready(block_forward(x, w, b, gamma, beta, None, groups=G))
    ref = jax.block_until_ready(ref_block(x, w, b, gamma, beta, None, groups=G))
    np.testing.assert_allclose(np.asarray(out), np.asarray(ref), rtol=TOL, atol=TOL)

    # forward with scale_shift
    out2 = jax.block_until_ready(
        block_forward(x, w, b, gamma, beta, (scale, shift), groups=G))
    ref2 = jax.block_until_ready(
        ref_block(x, w, b, gamma, beta, (scale, shift), groups=G))
    np.testing.assert_allclose(np.asarray(out2), np.asarray(ref2), rtol=TOL, atol=TOL)

    print("KERNEL_OK")
</pallas_src>

<mosaic_0001>
module attributes {stable_mosaic.version = 11 : i64} {
  func.func @kernel(%arg0: i32, %arg1: memref<2x12x288xbf16, #tpu.memory_space<vmem>>, %arg2: memref<3x16x12xbf16, #tpu.memory_space<vmem>>, %arg3: memref<16x8xf32, #tpu.memory_space<vmem>>, %arg4: memref<8x16xf32, #tpu.memory_space<vmem>>, %arg5: memref<3x16x1xf32, #tpu.memory_space<vmem>>, %arg6: memref<2x2x16x1xf32, #tpu.memory_space<vmem>>, %arg7: memref<2x16x256xf32, #tpu.memory_space<vmem>>, %arg8: memref<16x256xf32, #tpu.memory_space<vmem>>) attributes {dimension_semantics = [#tpu.dimension_semantics<parallel>], iteration_bounds = array<i64: 1>, scalar_prefetch = 0 : i64, scratch_operands = 1 : i64, tpu.core_type = #tpu.core_type<tc>, window_params = [{transform_indices = @transform_0, window_bounds = array<i64: 2, 12, 288>}, {pipeline_mode = #tpu.pipeline_mode<synchronous>, transform_indices = @transform_1, window_bounds = array<i64: 3, 16, 12>}, {pipeline_mode = #tpu.pipeline_mode<synchronous>, transform_indices = @transform_2, window_bounds = array<i64: 16, 8>}, {pipeline_mode = #tpu.pipeline_mode<synchronous>, transform_indices = @transform_3, window_bounds = array<i64: 8, 16>}, {pipeline_mode = #tpu.pipeline_mode<synchronous>, transform_indices = @transform_4, window_bounds = array<i64: 3, 16, 1>}, {transform_indices = @transform_5, window_bounds = array<i64: 2, 2, 16, 1>}, {transform_indices = @transform_6, window_bounds = array<i64: 2, 16, 256>}]} {
    %c0 = arith.constant 0 : index
    %c0_0 = arith.constant 0 : index
    %0 = vector.load %arg3[%c0, %c0_0] : memref<16x8xf32, #tpu.memory_space<vmem>>, vector<16x8xf32>
    %c0_1 = arith.constant 0 : index
    %c0_2 = arith.constant 0 : index
    %1 = vector.load %arg4[%c0_1, %c0_2] : memref<8x16xf32, #tpu.memory_space<vmem>>, vector<8x16xf32>
    %c0_3 = arith.constant 0 : index
    %c0_4 = arith.constant 0 : index
    %c0_5 = arith.constant 0 : index
    %2 = vector.load %arg5[%c0_3, %c0_4, %c0_5] : memref<3x16x1xf32, #tpu.memory_space<vmem>>, vector<1x16x1xf32>
    %3 = vector.shape_cast %2 : vector<1x16x1xf32> to vector<16x1xf32>
    %c1 = arith.constant 1 : index
    %c0_6 = arith.constant 0 : index
    %c0_7 = arith.constant 0 : index
    %4 = vector.load %arg5[%c1, %c0_6, %c0_7] : memref<3x16x1xf32, #tpu.memory_space<vmem>>, vector<1x16x1xf32>
    %5 = vector.shape_cast %4 : vector<1x16x1xf32> to vector<16x1xf32>
    %c2 = arith.constant 2 : index
    %c0_8 = arith.constant 0 : index
    %c0_9 = arith.constant 0 : index
    %6 = vector.load %arg5[%c2, %c0_8, %c0_9] : memref<3x16x1xf32, #tpu.memory_space<vmem>>, vector<1x16x1xf32>
    %7 = vector.shape_cast %6 : vector<1x16x1xf32> to vector<16x1xf32>
    %c0_10 = arith.constant 0 : index
    %c0_11 = arith.constant 0 : index
    %c0_12 = arith.constant 0 : index
    %8 = vector.load %arg2[%c0_10, %c0_11, %c0_12] : memref<3x16x12xbf16, #tpu.memory_space<vmem>>, vector<1x16x12xbf16>
    %9 = vector.shape_cast %8 : vector<1x16x12xbf16> to vector<16x12xbf16>
    %c0_13 = arith.constant 0 : index
    %c0_14 = arith.constant 0 : index
    %c0_15 = arith.constant 0 : index
    %10 = vector.load %arg1[%c0_13, %c0_14, %c0_15] : memref<2x12x288xbf16, #tpu.memory_space<vmem>>, vector<1x12x256xbf16>
    %11 = vector.shape_cast %10 : vector<1x12x256xbf16> to vector<12x256xbf16>
    %cst = arith.constant dense<0.000000e+00> : vector<16x256xf32>
    %12 = tpu.matmul %9, %11, %cst {dimension_numbers = #tpu.dot_dimension_numbers<[1], [0], [0], [1], [0, 0, 1, 1], [], []>} : vector<16x12xbf16>, vector<12x256xbf16>, vector<16x256xf32> -> vector<16x256xf32>
    %c0_16 = arith.constant 0 : index
    %c0_17 = arith.constant 0 : index
    %13 = vector.load %arg8[%c0_16, %c0_17] : memref<16x256xf32, #tpu.memory_space<vmem>>, vector<16x256xf32>
    tpu.vector_store %arg8[%c0_16, %c0_17], %12 {strides = array<i32>} : memref<16x256xf32, #tpu.memory_space<vmem>>, vector<16x256xf32>,
    %c0_18 = arith.constant 0 : index
    %c0_19 = arith.constant 0 : index
    %14 = vector.load %arg8[%c0_18, %c0_19] : memref<16x256xf32, #tpu.memory_space<vmem>>, vector<16x256xf32>
    %c1_20 = arith.constant 1 : index
    %c0_21 = arith.constant 0 : index
    %c0_22 = arith.constant 0 : index
    %15 = vector.load %arg2[%c1_20, %c0_21, %c0_22] : memref<3x16x12xbf16, #tpu.memory_space<vmem>>, vector<1x16x12xbf16>
    %16 = vector.shape_cast %15 : vector<1x16x12xbf16> to vector<16x12xbf16>
    %c0_23 = arith.constant 0 : index
    %c0_24 = arith.constant 0 : index
    %c16 = arith.constant 16 : index
    %17 = vector.load %arg1[%c0_23, %c0_24, %c16] : memref<2x12x288xbf16, #tpu.memory_space<vmem>>, vector<1x12x256xbf16>
    %18 = vector.shape_cast %17 : vector<1x12x256xbf16> to vector<12x256xbf16>
    %cst_25 = arith.constant dense<0.000000e+00> : vector<16x256xf32>
    %19 = tpu.matmul %16, %18, %cst_25 {dimension_numbers = #tpu.dot_dimension_numbers<[1], [0], [0], [1], [0, 0, 1, 1], [], []>} : vector<16x12xbf16>, vector<12x256xbf16>, vector<16x256xf32> -> vector<16x256xf32>
    %20 = arith.addf %14, %19 : vector<16x256xf32>
    %c0_26 = arith.constant 0 : index
    %c0_27 = arith.constant 0 : index
    %21 = vector.load %arg8[%c0_26, %c0_27] : memref<16x256xf32, #tpu.memory_space<vmem>>, vector<16x256xf32>
    tpu.vector_store %arg8[%c0_26, %c0_27], %20 {strides = array<i32>} : memref<16x256xf32, #tpu.memory_space<vmem>>, vector<16x256xf32>,
    %c0_28 = arith.constant 0 : index
    %c0_29 = arith.constant 0 : index
    %22 = vector.load %arg8[%c0_28, %c0_29] : memref<16x256xf32, #tpu.memory_space<vmem>>, vector<16x256xf32>
    %c2_30 = arith.constant 2 : index
    %c0_31 = arith.constant 0 : index
    %c0_32 = arith.constant 0 : index
    %23 = vector.load %arg2[%c2_30, %c0_31, %c0_32] : memref<3x16x12xbf16, #tpu.memory_space<vmem>>, vector<1x16x12xbf16>
    %24 = vector.shape_cast %23 : vector<1x16x12xbf16> to vector<16x12xbf16>
    %c0_33 = arith.constant 0 : index
    %c0_34 = arith.constant 0 : index
    %c32 = arith.constant 32 : index
    %25 = vector.load %arg1[%c0_33, %c0_34, %c32] : memref<2x12x288xbf16, #tpu.memory_space<vmem>>, vector<1x12x256xbf16>
    %26 = vector.shape_cast %25 : vector<1x12x256xbf16> to vector<12x256xbf16>
    %cst_35 = arith.constant dense<0.000000e+00> : vector<16x256xf32>
    %27 = tpu.matmul %24, %26, %cst_35 {dimension_numbers = #tpu.dot_dimension_numbers<[1], [0], [0], [1], [0, 0, 1, 1], [], []>} : vector<16x12xbf16>, vector<12x256xbf16>, vector<16x256xf32> -> vector<16x256xf32>
    %28 = arith.addf %22, %27 : vector<16x256xf32>
    %c0_36 = arith.constant 0 : index
    %c0_37 = arith.constant 0 : index
    %29 = vector.load %arg8[%c0_36, %c0_37] : memref<16x256xf32, #tpu.memory_space<vmem>>, vector<16x256xf32>
    tpu.vector_store %arg8[%c0_36, %c0_37], %28 {strides = array<i32>} : memref<16x256xf32, #tpu.memory_space<vmem>>, vector<16x256xf32>,
    %c0_38 = arith.constant 0 : index
    %c0_39 = arith.constant 0 : index
    %30 = vector.load %arg8[%c0_38, %c0_39] : memref<16x256xf32, #tpu.memory_space<vmem>>, vector<16x256xf32>
    %cst_40 = arith.constant dense<0.000000e+00> : vector<16xf32>
    %31 = vector.multi_reduction <add>, %30, %cst_40 [1] : vector<16x256xf32> to vector<16xf32>
    %32 = vector.shape_cast %31 : vector<16xf32> to vector<16x1xf32>
    %33 = arith.mulf %30, %30 : vector<16x256xf32>
    %cst_41 = arith.constant dense<0.000000e+00> : vector<16xf32>
    %34 = vector.multi_reduction <add>, %33, %cst_41 [1] : vector<16x256xf32> to vector<16xf32>
    %35 = vector.shape_cast %34 : vector<16xf32> to vector<16x1xf32>
    %cst_42 = arith.constant 2.560000e+02 : f32
    %36 = vector.broadcast %cst_42 : f32 to vector<16x1xf32>
    %37 = arith.mulf %36, %3 : vector<16x1xf32>
    %38 = arith.addf %32, %37 : vector<16x1xf32>
    %cst_43 = arith.constant 2.000000e+00 : f32
    %39 = vector.broadcast %cst_43 : f32 to vector<16x1xf32>
    %40 = arith.mulf %39, %3 : vector<16x1xf32>
    %41 = arith.mulf %40, %32 : vector<16x1xf32>
    %42 = arith.addf %35, %41 : vector<16x1xf32>
    %43 = arith.mulf %3, %3 : vector<16x1xf32>
    %cst_44 = arith.constant 2.560000e+02 : f32
    %44 = vector.broadcast %cst_44 : f32 to vector<16x1xf32>
    %45 = arith.mulf %44, %43 : vector<16x1xf32>
    %46 = arith.addf %42, %45 : vector<16x1xf32>
    %cst_45 = arith.constant dense<0.000000e+00> : vector<8x1xf32>
    %47 = tpu.matmul %1, %38, %cst_45 {dimension_numbers = #tpu.dot_dimension_numbers<[1], [0], [0], [1], [0, 0, 1, 1], [], []>} : vector<8x16xf32>, vector<16x1xf32>, vector<8x1xf32> -> vector<8x1xf32>
    %cst_46 = arith.constant dense<0.000000e+00> : vector<8x1xf32>
    %48 = tpu.matmul %1, %46, %cst_46 {dimension_numbers = #tpu.dot_dimension_numbers<[1], [0], [0], [1], [0, 0, 1, 1], [], []>} : vector<8x16xf32>, vector<16x1xf32>, vector<8x1xf32> -> vector<8x1xf32>
    %cst_47 = arith.constant 0.001953125 : f32
    %49 = vector.broadcast %cst_47 : f32 to vector<8x1xf32>
    %50 = arith.mulf %47, %49 : vector<8x1xf32>
    %cst_48 = arith.constant 0.001953125 : f32
    %51 = vector.broadcast %cst_48 : f32 to vector<8x1xf32>
    %52 = arith.mulf %48, %51 : vector<8x1xf32>
    %53 = arith.mulf %50, %50 : vector<8x1xf32>
    %54 = arith.subf %52, %53 : vector<8x1xf32>
    %cst_49 = arith.constant 9.99999974E-6 : f32
    %55 = vector.broadcast %cst_49 : f32 to vector<8x1xf32>
    %56 = arith.addf %54, %55 : vector<8x1xf32>
    %57 = math.rsqrt %56 : vector<8x1xf32>
    %cst_50 = arith.constant dense<0.000000e+00> : vector<16x1xf32>
    %58 = tpu.matmul %0, %50, %cst_50 {dimension_numbers = #tpu.dot_dimension_numbers<[1], [0], [0], [1], [0, 0, 1, 1], [], []>} : vector<16x8xf32>, vector<8x1xf32>, vector<16x1xf32> -> vector<16x1xf32>
    %cst_51 = arith.constant dense<0.000000e+00> : vector<16x1xf32>
    %59 = tpu.matmul %0, %57, %cst_51 {dimension_numbers = #tpu.dot_dimension_numbers<[1], [0], [0], [1], [0, 0, 1, 1], [], []>} : vector<16x8xf32>, vector<8x1xf32>, vector<16x1xf32> -> vector<16x1xf32>
    %c0_52 = arith.constant 0 : index
    %c0_53 = arith.constant 0 : index
    %c0_54 = arith.constant 0 : index
    %c0_55 = arith.constant 0 : index
    %60 = vector.load %arg6[%c0_52, %c0_53, %c0_54, %c0_55] : memref<2x2x16x1xf32, #tpu.memory_space<vmem>>, vector<1x1x16x1xf32>
    %61 = vector.shape_cast %60 : vector<1x1x16x1xf32> to vector<16x1xf32>
    %c0_56 = arith.constant 0 : index
    %c1_57 = arith.constant 1 : index
    %c0_58 = arith.constant 0 : index
    %c0_59 = arith.constant 0 : index
    %62 = vector.load %arg6[%c0_56, %c1_57, %c0_58, %c0_59] : memref<2x2x16x1xf32, #tpu.memory_space<vmem>>, vector<1x1x16x1xf32>
    %63 = vector.shape_cast %62 : vector<1x1x16x1xf32> to vector<16x1xf32>
    %64 = arith.mulf %59, %5 : vector<16x1xf32>
    %65 = arith.mulf %64, %61 : vector<16x1xf32>
    %66 = arith.subf %3, %58 : vector<16x1xf32>
    %67 = arith.mulf %66, %64 : vector<16x1xf32>
    %68 = arith.addf %7, %67 : vector<16x1xf32>
    %69 = arith.mulf %68, %61 : vector<16x1xf32>
    %70 = arith.addf %69, %63 : vector<16x1xf32>
    %71 = vector.broadcast %65 : vector<16x1xf32> to vector<16x256xf32>
    %72 = arith.mulf %30, %71 : vector<16x256xf32>
    %73 = vector.broadcast %70 : vector<16x1xf32> to vector<16x256xf32>
    %74 = arith.addf %72, %73 : vector<16x256xf32>
    %cst_60 = arith.constant 0.000000e+00 : f32
    %75 = vector.broadcast %cst_60 : f32 to vector<16x256xf32>
    %76 = arith.subf %75, %74 : vector<16x256xf32>
    %77 = math.exp %76 : vector<16x256xf32>
    %cst_61 = arith.constant 1.000000e+00 : f32
    %78 = vector.broadcast %cst_61 : f32 to vector<16x256xf32>
    %79 = arith.addf %78, %77 : vector<16x256xf32>
    %80 = tpu.reciprocal %79 {approx = true} : vector<16x256xf32> -> vector<16x256xf32>
    %81 = arith.mulf %74, %80 : vector<16x256xf32>
    %c0_62 = arith.constant 0 : index
    %c0_63 = arith.constant 0 : index
    %c0_64 = arith.constant 0 : index
    %82 = vector.load %arg7[%c0_62, %c0_63, %c0_64] : memref<2x16x256xf32, #tpu.memory_space<vmem>>, vector<1x16x256xf32>
    %83 = vector.shape_cast %82 : vector<1x16x256xf32> to vector<16x256xf32>
    %84 = vector.shape_cast %81 : vector<16x256xf32> to vector<1x16x256xf32>
    tpu.vector_store %arg7[%c0_62, %c0_63, %c0_64], %84 {strides = array<i32>} : memref<2x16x256xf32, #tpu.memory_space<vmem>>, vector<1x16x256xf32>,
    %c0_65 = arith.constant 0 : index
    %c0_66 = arith.constant 0 : index
    %c0_67 = arith.constant 0 : index
    %85 = vector.load %arg2[%c0_65, %c0_66, %c0_67] : memref<3x16x12xbf16, #tpu.memory_space<vmem>>, vector<1x16x12xbf16>
    %86 = vector.shape_cast %85 : vector<1x16x12xbf16> to vector<16x12xbf16>
    %c1_68 = arith.constant 1 : index
    %c0_69 = arith.constant 0 : index
    %c0_70 = arith.constant 0 : index
    %87 = vector.load %arg1[%c1_68, %c0_69, %c0_70] : memref<2x12x288xbf16, #tpu.memory_space<vmem>>, vector<1x12x256xbf16>
    %88 = vector.shape_cast %87 : vector<1x12x256xbf16> to vector<12x256xbf16>
    %cst_71 = arith.constant dense<0.000000e+00> : vector<16x256xf32>
    %89 = tpu.matmul %86, %88, %cst_71 {dimension_numbers = #tpu.dot_dimension_numbers<[1], [0], [0], [1], [0, 0, 1, 1], [], []>} : vector<16x12xbf16>, vector<12x256xbf16>, vector<16x256xf32> -> vector<16x256xf32>
    %c0_72 = arith.constant 0 : index
    %c0_73 = arith.constant 0 : index
    %90 = vector.load %arg8[%c0_72, %c0_73] : memref<16x256xf32, #tpu.memory_space<vmem>>, vector<16x256xf32>
    tpu.vector_store %arg8[%c0_72, %c0_73], %89 {strides = array<i32>} : memref<16x256xf32, #tpu.memory_space<vmem>>, vector<16x256xf32>,
    %c0_74 = arith.constant 0 : index
    %c0_75 = arith.constant 0 : index
    %91 = vector.load %arg8[%c0_74, %c0_75] : memref<16x256xf32, #tpu.memory_space<vmem>>, vector<16x256xf32>
    %c1_76 = arith.constant 1 : index
    %c0_77 = arith.constant 0 : index
    %c0_78 = arith.constant 0 : index
    %92 = vector.load %arg2[%c1_76, %c0_77, %c0_78] : memref<3x16x12xbf16, #tpu.memory_space<vmem>>, vector<1x16x12xbf16>
    %93 = vector.shape_cast %92 : vector<1x16x12xbf16> to vector<16x12xbf16>
    %c1_79 = arith.constant 1 : index
    %c0_80 = arith.constant 0 : index
    %c16_81 = arith.constant 16 : index
    %94 = vector.load %arg1[%c1_79, %c0_80, %c16_81] : memref<2x12x288xbf16, #tpu.memory_space<vmem>>, vector<1x12x256xbf16>
    %95 = vector.shape_cast %94 : vector<1x12x256xbf16> to vector<12x256xbf16>
    %cst_82 = arith.constant dense<0.000000e+00> : vector<16x256xf32>
    %96 = tpu.matmul %93, %95, %cst_82 {dimension_numbers = #tpu.dot_dimension_numbers<[1], [0], [0], [1], [0, 0, 1, 1], [], []>} : vector<16x12xbf16>, vector<12x256xbf16>, vector<16x256xf32> -> vector<16x256xf32>
    %97 = arith.addf %91, %96 : vector<16x256xf32>
    %c0_83 = arith.constant 0 : index
    %c0_84 = arith.constant 0 : index
    %98 = vector.load %arg8[%c0_83, %c0_84] : memref<16x256xf32, #tpu.memory_space<vmem>>, vector<16x256xf32>
    tpu.vector_store %arg8[%c0_83, %c0_84], %97 {strides = array<i32>} : memref<16x256xf32, #tpu.memory_space<vmem>>, vector<16x256xf32>,
    %c0_85 = arith.constant 0 : index
    %c0_86 = arith.constant 0 : index
    %99 = vector.load %arg8[%c0_85, %c0_86] : memref<16x256xf32, #tpu.memory_space<vmem>>, vector<16x256xf32>
    %c2_87 = arith.constant 2 : index
    %c0_88 = arith.constant 0 : index
    %c0_89 = arith.constant 0 : index
    %100 = vector.load %arg2[%c2_87, %c0_88, %c0_89] : memref<3x16x12xbf16, #tpu.memory_space<vmem>>, vector<1x16x12xbf16>
    %101 = vector.shape_cast %100 : vector<1x16x12xbf16> to vector<16x12xbf16>
    %c1_90 = arith.constant 1 : index
    %c0_91 = arith.constant 0 : index
    %c32_92 = arith.constant 32 : index
    %102 = vector.load %arg1[%c1_90, %c0_91, %c32_92] : memref<2x12x288xbf16, #tpu.memory_space<vmem>>, vector<1x12x256xbf16>
    %103 = vector.shape_cast %102 : vector<1x12x256xbf16> to vector<12x256xbf16>
    %cst_93 = arith.constant dense<0.000000e+00> : vector<16x256xf32>
    %104 = tpu.matmul %101, %103, %cst_93 {dimension_numbers = #tpu.dot_dimension_numbers<[1], [0], [0], [1], [0, 0, 1, 1], [], []>} : vector<16x12xbf16>, vector<12x256xbf16>, vector<16x256xf32> -> vector<16x256xf32>
    %105 = arith.addf %99, %104 : vector<16x256xf32>
    %c0_94 = arith.constant 0 : index
    %c0_95 = arith.constant 0 : index
    %106 = vector.load %arg8[%c0_94, %c0_95] : memref<16x256xf32, #tpu.memory_space<vmem>>, vector<16x256xf32>
    tpu.vector_store %arg8[%c0_94, %c0_95], %105 {strides = array<i32>} : memref<16x256xf32, #tpu.memory_space<vmem>>, vector<16x256xf32>,
    %c0_96 = arith.constant 0 : index
    %c0_97 = arith.constant 0 : index
    %107 = vector.load %arg8[%c0_96, %c0_97] : memref<16x256xf32, #tpu.memory_space<vmem>>, vector<16x256xf32>
    %cst_98 = arith.constant dense<0.000000e+00> : vector<16xf32>
    %108 = vector.multi_reduction <add>, %107, %cst_98 [1] : vector<16x256xf32> to vector<16xf32>
    %109 = vector.shape_cast %108 : vector<16xf32> to vector<16x1xf32>
    %110 = arith.mulf %107, %107 : vector<16x256xf32>
    %cst_99 = arith.constant dense<0.000000e+00> : vector<16xf32>
    %111 = vector.multi_reduction <add>, %110, %cst_99 [1] : vector<16x256xf32> to vector<16xf32>
    %112 = vector.shape_cast %111 : vector<16xf32> to vector<16x1xf32>
    %cst_100 = arith.constant 2.560000e+02 : f32
    %113 = vector.broadcast %cst_100 : f32 to vector<16x1xf32>
    %114 = arith.mulf %113, %3 : vector<16x1xf32>
    %115 = arith.addf %109, %114 : vector<16x1xf32>
    %cst_101 = arith.constant 2.000000e+00 : f32
    %116 = vector.broadcast %cst_101 : f32 to vector<16x1xf32>
    %117 = arith.mulf %116, %3 : vector<16x1xf32>
    %118 = arith.mulf %117, %109 : vector<16x1xf32>
    %119 = arith.addf %112, %118 : vector<16x1xf32>
    %120 = arith.mulf %3, %3 : vector<16x1xf32>
    %cst_102 = arith.constant 2.560000e+02 : f32
    %121 = vector.broadcast %cst_102 : f32 to vector<16x1xf32>
    %122 = arith.mulf %121, %120 : vector<16x1xf32>
    %123 = arith.addf %119, %122 : vector<16x1xf32>
    %cst_103 = arith.constant dense<0.000000e+00> : vector<8x1xf32>
    %124 = tpu.matmul %1, %115, %cst_103 {dimension_numbers = #tpu.dot_dimension_numbers<[1], [0], [0], [1], [0, 0, 1, 1], [], []>} : vector<8x16xf32>, vector<16x1xf32>, vector<8x1xf32> -> vector<8x1xf32>
    %cst_104 = arith.constant dense<0.000000e+00> : vector<8x1xf32>
    %125 = tpu.matmul %1, %123, %cst_104 {dimension_numbers = #tpu.dot_dimension_numbers<[1], [0], [0], [1], [0, 0, 1, 1], [], []>} : vector<8x16xf32>, vector<16x1xf32>, vector<8x1xf32> -> vector<8x1xf32>
    %cst_105 = arith.constant 0.001953125 : f32
    %126 = vector.broadcast %cst_105 : f32 to vector<8x1xf32>
    %127 = arith.mulf %124, %126 : vector<8x1xf32>
    %cst_106 = arith.constant 0.001953125 : f32
    %128 = vector.broadcast %cst_106 : f32 to vector<8x1xf32>
    %129 = arith.mulf %125, %128 : vector<8x1xf32>
    %130 = arith.mulf %127, %127 : vector<8x1xf32>
    %131 = arith.subf %129, %130 : vector<8x1xf32>
    %cst_107 = arith.constant 9.99999974E-6 : f32
    %132 = vector.broadcast %cst_107 : f32 to vector<8x1xf32>
    %133 = arith.addf %131, %132 : vector<8x1xf32>
    %134 = math.rsqrt %133 : vector<8x1xf32>
    %cst_108 = arith.constant dense<0.000000e+00> : vector<16x1xf32>
    %135 = tpu.matmul %0, %127, %cst_108 {dimension_numbers = #tpu.dot_dimension_numbers<[1], [0], [0], [1], [0, 0, 1, 1], [], []>} : vector<16x8xf32>, vector<8x1xf32>, vector<16x1xf32> -> vector<16x1xf32>
    %cst_109 = arith.constant dense<0.000000e+00> : vector<16x1xf32>
    %136 = tpu.matmul %0, %134, %cst_109 {dimension_numbers = #tpu.dot_dimension_numbers<[1], [0], [0], [1], [0, 0, 1, 1], [], []>} : vector<16x8xf32>, vector<8x1xf32>, vector<16x1xf32> -> vector<16x1xf32>
    %c1_110 = arith.constant 1 : index
    %c0_111 = arith.constant 0 : index
    %c0_112 = arith.constant 0 : index
    %c0_113 = arith.constant 0 : index
    %137 = vector.load %arg6[%c1_110, %c0_111, %c0_112, %c0_113] : memref<2x2x16x1xf32, #tpu.memory_space<vmem>>, vector<1x1x16x1xf32>
    %138 = vector.shape_cast %137 : vector<1x1x16x1xf32> to vector<16x1xf32>
    %c1_114 = arith.constant 1 : index
    %c1_115 = arith.constant 1 : index
    %c0_116 = arith.constant 0 : index
    %c0_117 = arith.constant 0 : index
    %139 = vector.load %arg6[%c1_114, %c1_115, %c0_116, %c0_117] : memref<2x2x16x1xf32, #tpu.memory_space<vmem>>, vector<1x1x16x1xf32>
    %140 = vector.shape_cast %139 : vector<1x1x16x1xf32> to vector<16x1xf32>
    %141 = arith.mulf %136, %5 : vector<16x1xf32>
    %142 = arith.mulf %141, %138 : vector<16x1xf32>
    %143 = arith.subf %3, %135 : vector<16x1xf32>
    %144 = arith.mulf %143, %141 : vector<16x1xf32>
    %145 = arith.addf %7, %144 : vector<16x1xf32>
    %146 = arith.mulf %145, %138 : vector<16x1xf32>
    %147 = arith.addf %146, %140 : vector<16x1xf32>
    %148 = vector.broadcast %142 : vector<16x1xf32> to vector<16x256xf32>
    %149 = arith.mulf %107, %148 : vector<16x256xf32>
    %150 = vector.broadcast %147 : vector<16x1xf32> to vector<16x256xf32>
    %151 = arith.addf %149, %150 : vector<16x256xf32>
    %cst_118 = arith.constant 0.000000e+00 : f32
    %152 = vector.broadcast %cst_118 : f32 to vector<16x256xf32>
    %153 = arith.subf %152, %151 : vector<16x256xf32>
    %154 = math.exp %153 : vector<16x256xf32>
    %cst_119 = arith.constant 1.000000e+00 : f32
    %155 = vector.broadcast %cst_119 : f32 to vector<16x256xf32>
    %156 = arith.addf %155, %154 : vector<16x256xf32>
    %157 = tpu.reciprocal %156 {approx = true} : vector<16x256xf32> -> vector<16x256xf32>
    %158 = arith.mulf %151, %157 : vector<16x256xf32>
    %c1_120 = arith.constant 1 : index
    %c0_121 = arith.constant 0 : index
    %c0_122 = arith.constant 0 : index
    %159 = vector.load %arg7[%c1_120, %c0_121, %c0_122] : memref<2x16x256xf32, #tpu.memory_space<vmem>>, vector<1x16x256xf32>
    %160 = vector.shape_cast %159 : vector<1x16x256xf32> to vector<16x256xf32>
    %161 = vector.shape_cast %158 : vector<16x256xf32> to vector<1x16x256xf32>
    tpu.vector_store %arg7[%c1_120, %c0_121, %c0_122], %161 {strides = array<i32>} : memref<2x16x256xf32, #tpu.memory_space<vmem>>, vector<1x16x256xf32>,
    return
  }
  func.func @transform_0(%arg0: i32) -> (i32, i32, i32) {
    %c0_i32 = arith.constant 0 : i32
    %c0_i32_0 = arith.constant 0 : i32
    %c0_i32_1 = arith.constant 0 : i32
    return %arg0, %c0_i32, %c0_i32_0 : i32, i32, i32
  }
  func.func @transform_1(%arg0: i32) -> (i32, i32, i32) {
    %c0_i32 = arith.constant 0 : i32
    %c0_i32_0 = arith.constant 0 : i32
    %c0_i32_1 = arith.constant 0 : i32
    %c0_i32_2 = arith.constant 0 : i32
    return %c0_i32, %c0_i32_0, %c0_i32_1 : i32, i32, i32
  }
  func.func @transform_2(%arg0: i32) -> (i32, i32) {
    %c0_i32 = arith.constant 0 : i32
    %c0_i32_0 = arith.constant 0 : i32
    %c0_i32_1 = arith.constant 0 : i32
    return %c0_i32, %c0_i32_0 : i32, i32
  }
  func.func @transform_3(%arg0: i32) -> (i32, i32) {
    %c0_i32 = arith.constant 0 : i32
    %c0_i32_0 = arith.constant 0 : i32
    %c0_i32_1 = arith.constant 0 : i32
    return %c0_i32, %c0_i32_0 : i32, i32
  }
  func.func @transform_4(%arg0: i32) -> (i32, i32, i32) {
    %c0_i32 = arith.constant 0 : i32
    %c0_i32_0 = arith.constant 0 : i32
    %c0_i32_1 = arith.constant 0 : i32
    %c0_i32_2 = arith.constant 0 : i32
    return %c0_i32, %c0_i32_0, %c0_i32_1 : i32, i32, i32
  }
  func.func @transform_5(%arg0: i32) -> (i32, i32, i32, i32) {
    %c0_i32 = arith.constant 0 : i32
    %c0_i32_0 = arith.constant 0 : i32
    %c0_i32_1 = arith.constant 0 : i32
    %c0_i32_2 = arith.constant 0 : i32
    return %arg0, %c0_i32, %c0_i32_0, %c0_i32_1 : i32, i32, i32, i32
  }
  func.func @transform_6(%arg0: i32) -> (i32, i32, i32) {
    %c0_i32 = arith.constant 0 : i32
    %c0_i32_0 = arith.constant 0 : i32
    %c0_i32_1 = arith.constant 0 : i32
    return %arg0, %c0_i32, %c0_i32_0 : i32, i32, i32
  }
}

</mosaic_0001>

<bundles_post_ra>
// kernel: tpu_custom_call.1
= control target key start
LH: loop header
LB: loop body
LE: loop exit
PB: predicated region body
PF: predicated region fallthrough
CT: control target
= control target key end

     0   :  { %s1165_s9 = smov 112   ;;  %vm57_vm0 = vcmask 1045504   ;;  %s1166_s26 = smov 96   ;;  %s1552_s0 = inlined_call_operand.vmem [shape: bf16[2,12,288], index: 0, kind: input, shape index: {}]   ;;  %s1553_s1 = inlined_call_operand.vmem [shape: bf16[3,16,12], index: 1, kind: input, shape index: {}]   ;;  %s1554_s2 = inlined_call_operand.vmem [shape: f32[16,8], index: 2, kind: input, shape index: {}]   ;;  %s1555_s3 = inlined_call_operand.vmem [shape: f32[8,16], index: 3, kind: input, shape index: {}]   ;;  %s1556_s4 = inlined_call_operand.vmem [shape: f32[3,16,1], index: 4, kind: input, shape index: {}]   ;;  %s1557_s5 = inlined_call_operand.vmem [shape: f32[2,2,16,1], index: 5, kind: input, shape index: {}]   ;;  %s1558_s6 = inlined_call_operand.hbm [shape: f32[2,16,256], index: 6, kind: output, shape index: {}]  }
   0x1   :  { %v964_v0 = vld [vmem:[%s1552_s0 + $0x8] sm:$0xf]  ;;  %v1076_v1 = vld [vmem:[%s1552_s0 + $0x10] sm:$0x30]  ;;  %v956_v3 = vld [vmem:[%s1552_s0] sm:$0xf] }
   0x2   :  { %v965_v2 = vor.u32 %v1076_v1, %v964_v0  ;;  %v1075_v4 = vld [vmem:[%s1552_s0 + $0x8] sm:$0x30]  ;;  %v976_v6 = vld [vmem:[%s1552_s0] sm:$0xf]  ;;  %v1074_v8 = vld [vmem:[%s1552_s0 + $0x4] sm:$0xf] }
   0x3   :  { %v957_v5 = vor.u32 %v1075_v4, %v956_v3  ;;  %v1079_v7 = vld [vmem:[%s1552_s0 + $0x8] sm:$0x30]  ;;  %v1078_v9 = vld [vmem:[%s1552_s0 + $0x4] sm:$0xf]  ;;  %v978_v10 = vld [vmem:[%s1552_s0 + $0xc] sm:$0x30] }
   0x4   :  { %129 = vrot.lane.b32.xlu1 %v965_v2, %s1165_s9  ;;  %v958_v11 = vld [vmem:[%s1552_s0 + $0xc] sm:$0x30]  ;;  %v981_v12 = vor.u32 %v1078_v9, %v978_v10  ;;  %v940_v13 = vld [vmem:[%s1552_s0] sm:$0xf]  ;;  %v1072_v14 = vld [vmem:[%s1552_s0 + $0x8] sm:$0x30] }
   0x5   :  { %125 = vrot.lane.b32.xlu0 %v957_v5, %s1165_s9  ;;  %v941_v15 = vor.u32 %v1072_v14, %v940_v13  ;;  %v1071_v16 = vld [vmem:[%s1552_s0 + $0x4] sm:$0xf]  ;;  %v942_v17 = vld [vmem:[%s1552_s0 + $0xc] sm:$0x30] }
   0x6   :  { %210 = vrot.lane.b32.xlu2 %v981_v12, %s1166_s26  ;;  %v945_v18 = vor.u32 %v1071_v16, %v942_v17 }
   0x7   :  { %11 = vsyncpa [#allocation4], 0  ;;  %v977_v19 = vor.u32 %v1079_v7, %v976_v6  ;;  %v984_v20 = vld [vmem:[%s1552_s0 + $0x8] sm:$0xf]  ;;  %v1080_v21 = vld [vmem:[%s1552_s0 + $0x10] sm:$0x30]  ;;  %v961_v23 = vor.u32 %v1074_v8, %v958_v11 }
   0x8   :  { %v59_v22 = vsel %vm57_vm0, %v941_v15, 0  ;;  %v62_v24 = vsel %vm57_vm0, %v945_v18, 0  ;;  %v985_v25 = vor.u32 %v1080_v21, %v984_v20  ;;  %v1070_v26 = vld [vmem:[%s1553_s1] sm:$0xff]  ;;  %vm53_vm1 = vcmask 97280   ;;  %v1077_v31 = vld [vmem:[%s1553_s1 + $0x10] sm:$0xff]  ;;  %v1073_v42 = vld [vmem:[%s1553_s1 + $0x8] sm:$0xff] }
   0x9   :  { %71 = vmatpush.bf16.msra.mxu0 %v59_v22  ;;  %85 = vmatpush.bf16.msra.mxu1 %v62_v24  ;;  %vm214_vm2 = vcmask 785408   ;;  %vm131_vm3 = vcmask 916480   ;;  %v1085_v7 = vld [vmem:[%s1552_s0 + $0x1c] sm:$0xf]  ;;  %v1026_v8 = vld [vmem:[%s1552_s0 + $0x24] sm:$0x30] }
   0xa   :  { %v1024_v9 = vld [vmem:[%s1552_s0 + $0x18] sm:$0xf]  ;;  %v1029_v10 = vor.u32 %v1085_v7, %v1026_v8  ;;  %v1086_v11 = vld [vmem:[%s1552_s0 + $0x20] sm:$0x30]  ;;  %v1032_v13 = vld [vmem:[%s1552_s0 + $0x20] sm:$0xf] }
   0xb   :  { %v1025_v12 = vor.u32 %v1086_v11, %v1024_v9  ;;  %v1087_v14 = vld [vmem:[%s1552_s0 + $0x28] sm:$0x30]  ;;  %v1089_v15 = vld [vmem:[%s1552_s0 + $0x1c] sm:$0xf]  ;;  %v1050_v16 = vld [vmem:[%s1552_s0 + $0x24] sm:$0x30] }
   0xc   :  { %208 = vrot.lane.b32.xlu1 %v977_v19, %s1166_s26  ;;  %946 = vmatmul.msk.bf16.vlgmr.msra.gmra.mxu0 %vm53_vm1, %v1070_v26  ;;  %v1033_v17 = vor.u32 %v1087_v14, %v1032_v13  ;;  %v1048_v18 = vld [vmem:[%s1552_s0 + $0x18] sm:$0xf]  ;;  %v1090_v19 = vld [vmem:[%s1552_s0 + $0x20] sm:$0x30]  ;;  %v1053_v20 = vor.u32 %v1089_v15, %v1050_v16  ;;  %v1341_v22 = vld [vmem:[%s1556_s4 + $0x8] sm:$0xff]  ;;  %vm298_vm4 = vcmask 130048  }
   0xd   :  { %127 = vrot.lane.b32.xlu0 %v961_v23, %s1165_s9  ;;  %947 = vmatmul.msk.bf16.vlgmr.msra.gmra.mxu1 %vm53_vm1, %v1070_v26  ;;  %v1049_v21 = vor.u32 %v1090_v19, %v1048_v18  ;;  %v1347_v23 = vld [vmem:[%s1556_s4] sm:$0xff]  ;;  %v1351_v24 = vmul.f32 2.0, %v1341_v22  ;;  %v293_v26 = vmul.f32 %v1341_v22, %v1341_v22  ;;  %vm357_vm5 = vcmask 64512   ;;  %v1088_v8 = vld [vmem:[%s1553_s1 + $0x10] sm:$0xff]  ;;  %v1084_v18 = vld [vmem:[%s1553_s1 + $0x8] sm:$0xff]  ;;  %s918_s12 = sshll.u32 %s1558_s6, 4  ;;  %s919_s12 = int_to_ptr.hbm [resolvable:$true] %s918_s12 }
   0xe   :  { %212 = vrot.lane.b32.xlu2 %v985_v25, %s1166_s26  ;;  %v1354_v25 = vmul.f32 256.0, %v1341_v22  ;;  %s1169_s13 = smov 256  }
  0x60   :  { %v211_v27 = vpop.permute.xlu2 %210 }
  0x68   :  { %v213_v28 = vpop.permute.xlu2 %212 }
  0x69   :  { %v216_v29 = vsel %vm214_vm2, %v211_v27, %v213_v28  ;;  %v1091_v28 = vld [vmem:[%s1552_s0 + $0x28] sm:$0x30] }
  0x6a   :  { %v224_v30 = vsel %vm57_vm0, %v216_v29, 0  ;;  %v1365_v29 = vmul.f32 256.0, %v1347_v23 }
  0x6b   :  { %247 = vmatpush.bf16.msrb.mxu1 %v224_v30 }
  0x6e   :  { %987 = vmatmul.msk.bf16.vlgmr.msrb.gmra.mxu1 %vm53_vm1, %v1077_v31 }
  0x76   :  { %v130_v32 = vpop.permute.xlu1 %129 }
  0x77   :  { %v126_v33 = vpop.permute.xlu0 %125 }
  0x7e   :  { %v209_v34 = vpop.permute.xlu1 %208 }
  0x7f   :  { %v128_v35 = vpop.permute.xlu0 %127  ;;  %v215_v36 = vsel %vm214_vm2, %v209_v34, %v211_v27  ;;  %v1056_v27 = vld [vmem:[%s1552_s0 + $0x20] sm:$0xf] }
  0x80   :  { %v132_v37 = vsel %vm131_vm3, %v126_v33, %v128_v35  ;;  %v133_v38 = vsel %vm131_vm3, %v128_v35, %v130_v32  ;;  %v221_v39 = vsel %vm57_vm0, %v215_v36, 0  ;;  %v1057_v32 = vor.u32 %v1091_v28, %v1056_v27 }
  0x81   :  { %v138_v40 = vsel %vm57_vm0, %v132_v37, 0  ;;  %v141_v41 = vsel %vm57_vm0, %v133_v38, 0  ;;  %233 = vmatpush.bf16.msrb.mxu0 %v221_v39  ;;  %v1369_v35 = vmul.f32 256.0, %v293_v26  ;;  %v1375_v39 = vld [vmem:[%s1555_s3] sm:$0xff] }
  0x82   :  { %150 = vmatpush.bf16.msra.mxu2 %v138_v40  ;;  %164 = vmatpush.bf16.msra.mxu3 %v141_v41  ;;  %v1379_v40 = vmul.f32 2.0, %v1347_v23 }
  0x84   :  { %986 = vmatmul.msk.bf16.vlgmr.msrb.gmra.mxu0 %vm53_vm1, %v1077_v31 }
  0x85   :  { %966 = vmatmul.msk.bf16.vlgmr.msra.gmra.mxu2 %vm53_vm1, %v1073_v42  ;;  %967 = vmatmul.msk.bf16.vlgmr.msra.gmra.mxu3 %vm53_vm1, %v1073_v42  ;;  %v292_v42 = vmul.f32 %v1347_v23, %v1347_v23 }
  0x89   :  { %v73_v43 = vpop.f32.mrf.mxu0 }
  0x8a   :  { %v87_v44 = vpop.f32.mrf.mxu1 }
  0x91   :  { %v75_v45 = vpop.f32.mrf.mxu0 }
  0x92   :  { %v89_v46 = vpop.f32.mrf.mxu1 }
  0xeb   :  { %v249_v48 = vpop.f32.mrf.mxu1 }
  0xf3   :  { %v251_v61 = vpop.f32.mrf.mxu1 }
 0x101   :  { %v235_v47 = vpop.f32.mrf.mxu0 }
 0x108   :  { %v152_v49 = vpop.f32.mrf.mxu2  ;;  %v166_v50 = vpop.f32.mrf.mxu3 }
 0x109   :  { %v171_v51 = vadd.f32 %v152_v49, %v73_v43  ;;  %v172_v52 = vadd.f32 %v166_v50, %v87_v44  ;;  %v237_v60 = vpop.f32.mrf.mxu0  ;;  %v1387_v44 = vmul.f32 256.0, %v292_v42  ;;  %v1083_v49 = vld [vmem:[%s1552_s0 + $0x20] sm:$0x30] }
 0x10b   :  { %v1285_v53 = vadd.f32 %v235_v47, %v171_v51  ;;  %v1287_v54 = vadd.f32 %v249_v48, %v172_v52  ;;  %v1004_v48 = vld [vmem:[%s1552_s0 + $0x18] sm:$0xf]  ;;  %v1081_v52 = vld [vmem:[%s1553_s1] sm:$0xff]  ;;  %s1170_s1 = smov 16  }
 0x10c   :  { %v1005_v50 = vor.u32 %v1083_v49, %v1004_v48 }
 0x10d   :  { %v266_v55 = vadd.f32 %v1287_v54, %v1285_v53  ;;  %v272_v4 = vmul.f32 %v1285_v53, %v1285_v53  ;;  %v273_v5 = vmul.f32 %v1287_v54, %v1287_v54 }
 0x10e   :  { %v507_v51 = vsel %vm57_vm0, %v1005_v50, 0 }
 0x10f   :  { %267 = vadd.xlane.f32.xlu1 %v266_v55  ;;  %v276_v6 = vadd.f32 %v273_v5, %v272_v4  ;;  %519 = vmatpush.bf16.msra.mxu0 %v507_v51 }
 0x110   :  { %v154_v56 = vpop.f32.mrf.mxu2  ;;  %v168_v57 = vpop.f32.mrf.mxu3 }
 0x111   :  { %v173_v58 = vadd.f32 %v154_v56, %v75_v45  ;;  %v174_v59 = vadd.f32 %v168_v57, %v89_v46  ;;  %v1082_v57 = vld [vmem:[%s1552_s0 + $0x1c] sm:$0xf] }
 0x112   :  { %1010 = vmatmul.msk.bf16.vlgmr.msra.gmra.mxu0 %vm53_vm1, %v1081_v52 }
 0x113   :  { %v1291_v62 = vadd.f32 %v237_v60, %v173_v58  ;;  %v1293_v63 = vadd.f32 %v251_v61, %v174_v59  ;;  %v1006_v58 = vld [vmem:[%s1552_s0 + $0x24] sm:$0x30] }
 0x114   :  { %v1009_v59 = vor.u32 %v1082_v57, %v1006_v58 }
 0x115   :  { %v269_v0 = vadd.f32 %v1293_v63, %v1291_v62  ;;  %v274_v1 = vmul.f32 %v1291_v62, %v1291_v62  ;;  %v275_v2 = vmul.f32 %v1293_v63, %v1293_v63 }
 0x116   :  { %v510_v61 = vsel %vm57_vm0, %v1009_v59, 0 }
 0x117   :  { %270 = vadd.xlane.f32.xlu0 %v269_v0  ;;  %v279_v3 = vadd.f32 %v275_v2, %v274_v1  ;;  %533 = vmatpush.bf16.msra.mxu1 %v510_v61 }
 0x119   :  { %280 = vadd.xlane.f32.xlu2 %v279_v3  ;;  %v1414_v3 = vld [vmem:[%s1554_s2] sm:$0xff] }
 0x11a   :  { %1011 = vmatmul.msk.bf16.vlgmr.msra.gmra.mxu1 %vm53_vm1, %v1081_v52 }
 0x121   :  { %277 = vadd.xlane.f32.xlu2 %v276_v6 }
 0x128   :  { %574 = vrot.lane.b32.xlu1 %v1029_v10, %s1165_s9  ;;  %v1429_v10 = vld [vmem:[%s1554_s2 + $0x8] sm:$0xff] }
 0x12b   :  { %572 = vrot.lane.b32.xlu0 %v1025_v12, %s1165_s9 }
 0x130   :  { %655 = vrot.lane.b32.xlu1 %v1053_v20, %s1166_s26 }
 0x133   :  { %653 = vrot.lane.b32.xlu0 %v1049_v21, %s1166_s26 }
 0x139   :  { %576 = vrot.lane.b32.xlu2 %v1033_v17, %s1165_s9 }
 0x13b   :  { %657 = vrot.lane.b32.xlu0 %v1057_v32, %s1166_s26 }
 0x182   :  { %v268_v30 = vpop.xlane.xlu1 %267 }
 0x183   :  { %v284_v38 = vadd.f32 %v1365_v29, %v268_v30  ;;  %v288_v43 = vmul.f32 %v1379_v40, %v268_v30 }
 0x18a   :  { %v271_v31 = vpop.xlane.xlu0 %270 }
 0x18b   :  { %v289_v33 = vmul.f32 %v1351_v24, %v271_v31  ;;  %v285_v34 = vadd.f32 %v1354_v25, %v271_v31 }
 0x18c   :  { %v281_v36 = vpop.xlane.xlu2 %280 }
 0x18d   :  { %v291_v37 = vadd.f32 %v289_v33, %v281_v36  ;;  %316 = vmatpush.msrb.mxu2 %v285_v34 }
 0x18f   :  { %317 = vmatpush.msrb.mxu2 %v284_v38  ;;  %v297_v41 = vadd.f32 %v1369_v35, %v291_v37  ;;  %v521_v36 = vpop.f32.mrf.mxu0 }
 0x190   :  { %988 = vmatmul.msk.f32.vlgmr.msrb.gmra.mxu2 %vm298_vm4, %v1375_v39 }
 0x191   :  { %336 = vmatpush.msrb.mxu3 %v297_v41 }
 0x194   :  { %v278_v45 = vpop.xlane.xlu2 %277 }
 0x195   :  { %v290_v46 = vadd.f32 %v288_v43, %v278_v45 }
 0x197   :  { %v296_v47 = vadd.f32 %v1387_v44, %v290_v46  ;;  %v535_v37 = vpop.f32.mrf.mxu1  ;;  %v523_v42 = vpop.f32.mrf.mxu0 }
 0x199   :  { %337 = vmatpush.msrb.mxu3 %v296_v47  ;;  %v1167_v47 = vmov 0  }
 0x19a   :  { %989 = vmatmul.msk.f32.vlgmr.msrb.gmra.mxu3 %vm298_vm4, %v1375_v39  ;;  %v575_v55 = vpop.permute.xlu1 %574  ;;  %1100 = vset.pattern.permute.xlu1 %v1167_v47 }
 0x19b   :  { %1101 = vset.pattern.permute.xlu0 %v1167_v47  ;;  %1102 = vset.pattern.permute.xlu2 %v1167_v47 }
 0x19c   :  { %v577_v27 = vpop.permute.xlu2 %576 }
 0x19d   :  { %v573_v56 = vpop.permute.xlu0 %572  ;;  %v579_v30 = vsel %vm131_vm3, %v575_v55, %v577_v27 }
 0x19e   :  { %v578_v60 = vsel %vm131_vm3, %v573_v56, %v575_v55  ;;  %v587_v33 = vsel %vm57_vm0, %v579_v30, 0 }
 0x19f   :  { %v584_v5 = vsel %vm57_vm0, %v578_v60, 0  ;;  %v537_v43 = vpop.f32.mrf.mxu1 }
 0x1a2   :  { %v656_v1 = vpop.permute.xlu1 %655 }
 0x1a5   :  { %v654_v4 = vpop.permute.xlu0 %653 }
 0x1a6   :  { %v659_v6 = vsel %vm214_vm2, %v654_v4, %v656_v1 }
 0x1a7   :  { %v665_v7 = vsel %vm57_vm0, %v659_v6, 0 }
 0x1a8   :  { %677 = vmatpush.bf16.msrb.mxu0 %v665_v7 }
 0x1ab   :  { %1058 = vmatmul.msk.bf16.vlgmr.msrb.gmra.mxu0 %vm53_vm1, %v1088_v8 }
 0x1ad   :  { %v658_v13 = vpop.permute.xlu0 %657 }
 0x1ae   :  { %v660_v15 = vsel %vm214_vm2, %v656_v1, %v658_v13 }
 0x1af   :  { %v668_v16 = vsel %vm57_vm0, %v660_v15, 0 }
 0x1b0   :  { %691 = vmatpush.bf16.msrb.mxu1 %v668_v16  ;;  %v1477_v16 = vld [vmem:[%s1556_s4 + $0x10] sm:$0xff] }
 0x1b3   :  { %1059 = vmatmul.msk.bf16.vlgmr.msrb.gmra.mxu1 %vm53_vm1, %v1088_v8 }
 0x213   :  { %v319_v0 = vpop.f32.mrf.mxu2 }
 0x214   :  { %v342_v2 = vmul.f32 0.001953125, %v319_v0 }
 0x216   :  { %379 = vmatpush.msra.mxu2 %v342_v2  ;;  %v344_v9 = vmul.f32 %v342_v2, %v342_v2 }
 0x217   :  { %990 = vmatmul.msk.f32.vlgmr.msra.gmra.mxu2 %vm357_vm5, %v1414_v3 }
 0x218   :  { %596 = vmatpush.bf16.msrb.mxu2 %v584_v5 }
 0x21d   :  { %v339_v11 = vpop.f32.mrf.mxu3 }
 0x21e   :  { %v343_v12 = vmul.f32 0.001953125, %v339_v11  ;;  %v1468_v11 = vld [vmem:[%s1556_s4 + $0x18] sm:$0xff] }
 0x21f   :  { %991 = vmatmul.msk.f32.gmra.mxu2 %vm357_vm5, %v1429_v10 }
 0x220   :  { %v345_v14 = vsub.f32 %v343_v12, %v344_v9 }
 0x222   :  { %v346_v17 = vadd.f32 1e-05, %v345_v14 }
 0x224   :  { %1103 = vrsqrt.f32 %v346_v17  ;;  %vm353_vm7 = vweird.f32 %v346_v17 }
 0x227   :  { %1034 = vmatmul.msk.bf16.vlgmr.msrb.gmra.mxu2 %vm53_vm1, %v1084_v18 }
 0x228   :  { %v679_v48 = vpop.f32.mrf.mxu0 }
 0x22a   :  { %v1104_v19 = vpop.eup %1103 }
 0x22b   :  { %v348_v20 = vmul.f32 %v1104_v19, %v346_v17  ;;  %vm354_vm6 = vweird.f32 %v1104_v19 }
 0x22c   :  { %vm355_vm8 = vmor %vm353_vm7, %vm354_vm6 }
 0x22d   :  { %v349_v21 = vmul.f32 %v1104_v19, %v348_v20  ;;  %v1486_v20 = vld [vmem:[%s1556_s4 + $0x28] sm:$0xff] }
 0x22f   :  { %v350_v26 = vmul.f32 0.5, %v349_v21 }
 0x230   :  { %v693_v50 = vpop.f32.mrf.mxu1  ;;  %v681_v60 = vpop.f32.mrf.mxu0 }
 0x231   :  { %v351_v28 = vsub.f32 1.5, %v350_v26 }
 0x233   :  { %v352_v31 = vmul.f32 %v1104_v19, %v351_v28  ;;  %v411_v28 = vld [vmem:[%s1557_s5 + $0x8] sm:$0xff] }
 0x235   :  { %v356_v32 = vsel %vm355_vm8, %v1104_v19, %v352_v31  ;;  %v410_v19 = vld [vmem:[%s1557_s5] sm:$0xff] }
 0x236   :  { %402 = vmatpush.msra.mxu3 %v356_v32  ;;  %v1496_v31 = vld [vmem:[%s1556_s4 + $0x20] sm:$0xff] }
 0x237   :  { %992 = vmatmul.msk.f32.vlgmr.msra.gmra.mxu3 %vm357_vm5, %v1414_v3 }
 0x238   :  { %610 = vmatpush.bf16.msrb.mxu3 %v587_v33  ;;  %v695_v2 = vpop.f32.mrf.mxu1 }
 0x23f   :  { %993 = vmatmul.msk.f32.gmra.mxu3 %vm357_vm5, %v1429_v10 }
 0x247   :  { %1035 = vmatmul.msk.bf16.vlgmr.msrb.gmra.mxu3 %vm53_vm1, %v1084_v18 }
 0x29a   :  { %v381_v34 = vpop.f32.mrf.mxu2 }
 0x29b   :  { %v419_v21 = vsub.f32 %v1347_v23, %v381_v34  ;;  %v995_v34 = vld [vmem:[%s1557_s5 + $0x18] sm:$0xff] }
 0x2a2   :  { %v384_v38 = vpop.f32.mrf.mxu2 }
 0x2a3   :  { %v420_v14 = vsub.f32 %v1341_v22, %v384_v38 }
 0x2aa   :  { %v598_v45 = vpop.f32.mrf.mxu2 }
 0x2ab   :  { %v617_v49 = vadd.f32 %v598_v45, %v521_v36 }
 0x2ad   :  { %v1447_v56 = vadd.f32 %v679_v48, %v617_v49 }
 0x2af   :  { %v716_v12 = vmul.f32 %v1447_v56, %v1447_v56 }
 0x2b2   :  { %v600_v55 = vpop.f32.mrf.mxu2 }
 0x2b3   :  { %v619_v58 = vadd.f32 %v600_v55, %v523_v42 }
 0x2b5   :  { %v1453_v0 = vadd.f32 %v681_v60, %v619_v58 }
 0x2b7   :  { %v718_v6 = vmul.f32 %v1453_v0, %v1453_v0 }
 0x2ba   :  { %v404_v41 = vpop.f32.mrf.mxu3 }
 0x2bb   :  { %v415_v17 = vmul.f32 %v1477_v16, %v404_v41  ;;  %v994_v41 = vld [vmem:[%s1557_s5 + $0x10] sm:$0xff] }
 0x2bd   :  { %v417_v26 = vmul.f32 %v415_v17, %v410_v19  ;;  %v421_v30 = vmul.f32 %v419_v21, %v415_v17 }
 0x2bf   :  { %v423_v36 = vadd.f32 %v1496_v31, %v421_v30 }
 0x2c1   :  { %v425_v38 = vmul.f32 %v423_v36, %v410_v19 }
 0x2c2   :  { %v407_v46 = vpop.f32.mrf.mxu3 }
 0x2c3   :  { %v416_v15 = vmul.f32 %v1468_v11, %v407_v46  ;;  %v427_v42 = vadd.f32 %v994_v41, %v425_v38 }
 0x2c5   :  { %v422_v18 = vmul.f32 %v420_v14, %v416_v15  ;;  %v418_v33 = vmul.f32 %v416_v15, %v411_v28 }
 0x2c7   :  { %v424_v27 = vadd.f32 %v1486_v20, %v422_v18 }
 0x2c9   :  { %v426_v32 = vmul.f32 %v424_v27, %v411_v28 }
 0x2ca   :  { %v612_v51 = vpop.f32.mrf.mxu3 }
 0x2cb   :  { %v618_v52 = vadd.f32 %v612_v51, %v535_v37  ;;  %v428_v37 = vadd.f32 %v995_v34, %v426_v32 }
 0x2cd   :  { %v1449_v57 = vadd.f32 %v693_v50, %v618_v52 }
 0x2cf   :  { %v710_v59 = vadd.f32 %v1449_v57, %v1447_v56  ;;  %v717_v9 = vmul.f32 %v1449_v57, %v1449_v57 }
 0x2d1   :  { %711 = vadd.xlane.f32.xlu1 %v710_v59  ;;  %v720_v13 = vadd.f32 %v717_v9, %v716_v12 }
 0x2d2   :  { %v614_v61 = vpop.f32.mrf.mxu3 }
 0x2d3   :  { %v620_v1 = vadd.f32 %v614_v61, %v537_v43 }
 0x2d5   :  { %v1455_v4 = vadd.f32 %v695_v2, %v620_v1 }
 0x2d7   :  { %v713_v5 = vadd.f32 %v1455_v4, %v1453_v0  ;;  %v719_v7 = vmul.f32 %v1455_v4, %v1455_v4 }
 0x2d9   :  { %714 = vadd.xlane.f32.xlu2 %v713_v5  ;;  %v723_v8 = vadd.f32 %v719_v7, %v718_v6 }
 0x2db   :  { %724 = vadd.xlane.f32.xlu0 %v723_v8 }
 0x2e1   :  { %721 = vadd.xlane.f32.xlu2 %v720_v13 }
 0x2ea   :  { %431 = vperm.xlu1 %1100, %v417_v26  }
 0x2ef   :  { %436 = vperm.xlu0 %1101, %v418_v33  }
 0x2f2   :  { %450 = vperm.xlu1 %1100, %v428_v37  }
 0x2f9   :  { %445 = vperm.xlu2 %1102, %v427_v42  }
 0x344   :  { %v712_v43 = vpop.xlane.xlu1 %711 }
 0x345   :  { %v726_v49 = vadd.f32 %v712_v43, %v1365_v29  ;;  %v728_v52 = vmul.f32 %v712_v43, %v1379_v40 }
 0x34c   :  { %v715_v45 = vpop.xlane.xlu2 %714 }
 0x34d   :  { %v727_v46 = vadd.f32 %v715_v45, %v1354_v25  ;;  %v729_v47 = vmul.f32 %v715_v45, %v1351_v24 }
 0x34e   :  { %v725_v48 = vpop.xlane.xlu0 %724 }
 0x34f   :  { %v731_v50 = vadd.f32 %v729_v47, %v725_v48  ;;  %748 = vmatpush.msra.mxu2 %v727_v46 }
 0x351   :  { %v733_v51 = vadd.f32 %v731_v50, %v1369_v35  ;;  %749 = vmatpush.msra.mxu2 %v726_v49 }
 0x352   :  { %1060 = vmatmul.msk.f32.vlgmr.msra.gmra.mxu2 %vm298_vm4, %v1375_v39 }
 0x353   :  { %768 = vmatpush.msra.mxu3 %v733_v51 }
 0x354   :  { %v722_v55 = vpop.xlane.xlu2 %721 }
 0x355   :  { %v730_v58 = vadd.f32 %v728_v52, %v722_v55 }
 0x357   :  { %v732_v25 = vadd.f32 %v730_v58, %v1387_v44 }
 0x359   :  { %769 = vmatpush.msra.mxu3 %v732_v25 }
 0x35a   :  { %1061 = vmatmul.msk.f32.vlgmr.msra.gmra.mxu3 %vm298_vm4, %v1375_v39 }
 0x35c   :  { %v432_v24 = vpop.permute.xlu1 %431  ;;  %v446_v59 = vpop.permute.xlu2 %445 }
 0x35d   :  { %v439_v29 = vmul.f32 %v432_v24, %v1285_v53  ;;  %v440_v35 = vmul.f32 %v432_v24, %v1287_v54 }
 0x35f   :  { %v453_v60 = vadd.f32 %v446_v59, %v439_v29  ;;  %v454_v61 = vadd.f32 %v446_v59, %v440_v35  ;;  %v1066_v29 = vld [vmem:[%s1557_s5 + $0x20] sm:$0xff] }
 0x361   :  { %v457_v1 = vsub.f32 0.0, %v453_v60  ;;  %v458_v2 = vsub.f32 0.0, %v454_v61  ;;  %v437_v40 = vpop.permute.xlu0 %436 }
 0x362   :  { %v441_v5 = vmul.f32 %v437_v40, %v1291_v62  ;;  %v442_v6 = vmul.f32 %v437_v40, %v1293_v63 }
 0x363   :  { %v461_v44 = vmul.f32 1.442695, %v457_v1  ;;  %v463_v7 = vmul.f32 1.442695, %v458_v2 }
 0x364   :  { %v451_v8 = vpop.permute.xlu1 %450 }
 0x365   :  { %1105 = vpow2.f32 %v461_v44  ;;  %v455_v39 = vadd.f32 %v451_v8, %v441_v5  ;;  %v456_v9 = vadd.f32 %v451_v8, %v442_v6 }
 0x366   :  { %1107 = vpow2.f32 %v463_v7  ;;  %v1069_v7 = vld [vmem:[%s1557_s5 + $0x38] sm:$0xff] }
 0x367   :  { %v459_v53 = vsub.f32 0.0, %v455_v39  ;;  %v460_v12 = vsub.f32 0.0, %v456_v9 }
 0x369   :  { %v465_v54 = vmul.f32 1.442695, %v459_v53  ;;  %v467_v13 = vmul.f32 1.442695, %v460_v12 }
 0x36b   :  { %v1106_v14 = vpop.eup %1105  ;;  %1109 = vpow2.f32 %v465_v54 }
 0x36c   :  { %v1108_v15 = vpop.eup %1107  ;;  %v469_v17 = vadd.f32 1.0, %v1106_v14  ;;  %1111 = vpow2.f32 %v467_v13 }
 0x36d   :  { %v470_v18 = vadd.f32 1.0, %v1108_v15 }
 0x36e   :  { %1113 = vrcp.f32 %v469_v17 }
 0x36f   :  { %1115 = vrcp.f32 %v470_v18 }
 0x371   :  { %v1110_v62 = vpop.eup %1109 }
 0x372   :  { %v1112_v63 = vpop.eup %1111  ;;  %v471_v19 = vadd.f32 1.0, %v1110_v62 }
 0x373   :  { %v472_v21 = vadd.f32 1.0, %v1112_v63 }
 0x374   :  { %v1114_v26 = vpop.eup %1113  ;;  %1117 = vrcp.f32 %v471_v19 }
 0x375   :  { %v1116_v27 = vpop.eup %1115  ;;  %v477_v28 = vmul.f32 %v1114_v26, %v453_v60  ;;  %1119 = vrcp.f32 %v472_v21 }
 0x376   :  { %v478_v30 = vmul.f32 %v1116_v27, %v454_v61 }
 0x377   :  { %481 = vst [vmem:[#allocation3] sm:$0xff] %v477_v28 }
 0x378   :  { %482 = vst [vmem:[#allocation3 + $0x8] sm:$0xff] %v478_v30 }
 0x37a   :  { %v1118_v32 = vpop.eup %1117 }
 0x37b   :  { %v1120_v33 = vpop.eup %1119  ;;  %v479_v34 = vmul.f32 %v1118_v32, %v455_v39 }
 0x37c   :  { %v480_v36 = vmul.f32 %v1120_v33, %v456_v9 }
 0x37d   :  { %483 = vst [vmem:[#allocation3 + $0x10] sm:$0xff] %v479_v34 }
 0x37e   :  { %484 = vst [vmem:[#allocation3 + $0x18] sm:$0xff] %v480_v36 }
 0x3d5   :  { %v751_v37 = vpop.f32.mrf.mxu2 }
 0x3d6   :  { %v774_v38 = vmul.f32 0.001953125, %v751_v37 }
 0x3d8   :  { %804 = vmatpush.msra.mxu0 %v774_v38  ;;  %1092 = vmatpush.msrb.mxu2 %v774_v38  ;;  %v776_v41 = vmul.f32 %v774_v38, %v774_v38 }
 0x3d9   :  { %1062 = vmatmul.msk.f32.vlgmr.msra.gmra.mxu0 %vm357_vm5, %v1414_v3  ;;  %1063 = vmatmul.msk.f32.vlgmr.msrb.gmra.mxu2 %vm357_vm5, %v1429_v10 }
 0x3dd   :  { %v771_v42 = vpop.f32.mrf.mxu3 }
 0x3de   :  { %v775_v43 = vmul.f32 0.001953125, %v771_v42 }
 0x3e0   :  { %v777_v45 = vsub.f32 %v775_v43, %v776_v41 }
 0x3e2   :  { %v778_v46 = vadd.f32 1e-05, %v777_v45 }
 0x3e4   :  { %1121 = vrsqrt.f32 %v778_v46  ;;  %vm785_vm10 = vweird.f32 %v778_v46 }
 0x3ea   :  { %v1122_v47 = vpop.eup %1121 }
 0x3eb   :  { %v780_v48 = vmul.f32 %v1122_v47, %v778_v46  ;;  %vm786_vm9 = vweird.f32 %v1122_v47 }
 0x3ec   :  { %vm787_vm11 = vmor %vm785_vm10, %vm786_vm9 }
 0x3ed   :  { %v781_v49 = vmul.f32 %v1122_v47, %v780_v48 }
 0x3ef   :  { %v782_v50 = vmul.f32 0.5, %v781_v49 }
 0x3f1   :  { %v783_v51 = vsub.f32 1.5, %v782_v50 }
 0x3f3   :  { %v784_v52 = vmul.f32 %v1122_v47, %v783_v51 }
 0x3f5   :  { %v788_v55 = vsel %vm787_vm11, %v1122_v47, %v784_v52 }
 0x3f6   :  { %827 = vmatpush.msra.mxu1 %v788_v55  ;;  %1093 = vmatpush.msrb.mxu3 %v788_v55 }
 0x3f7   :  { %1064 = vmatmul.msk.f32.vlgmr.msra.gmra.mxu1 %vm357_vm5, %v1414_v3  ;;  %1065 = vmatmul.msk.f32.vlgmr.msrb.gmra.mxu3 %vm357_vm5, %v1429_v10  ;;  %v1068_v10 = vld [vmem:[%s1557_s5 + $0x30] sm:$0xff] }
 0x456   :  { %v806_v58 = vpop.f32.mrf.mxu0 }
 0x457   :  { %v845_v25 = vsub.f32 %v1347_v23, %v806_v58  ;;  %v1067_v23 = vld [vmem:[%s1557_s5 + $0x28] sm:$0xff]  ;;  %s1168_s5 = smov [#allocation3]  }
 0x458   :  { %s916_s8 = sshll.u32 %s1168_s5, 4  ;;  %s917_s8 = int_to_ptr.vmem [resolvable:$true] %s916_s8 }
 0x45c   :  { %v809_v59 = vpop.f32.mrf.mxu2 }
 0x45d   :  { %v846_v3 = vsub.f32 %v1341_v22, %v809_v59 }
 0x474   :  { %v829_v24 = vpop.f32.mrf.mxu1 }
 0x475   :  { %v841_v35 = vmul.f32 %v1477_v16, %v829_v24 }
 0x477   :  { %v843_v60 = vmul.f32 %v1066_v29, %v841_v35  ;;  %v847_v61 = vmul.f32 %v845_v25, %v841_v35 }
 0x479   :  { %v849_v1 = vadd.f32 %v1496_v31, %v847_v61  ;;  %857 = vperm.xlu2 %1102, %v843_v60  }
 0x47a   :  { %v832_v2 = vpop.f32.mrf.mxu3 }
 0x47b   :  { %v842_v40 = vmul.f32 %v1468_v11, %v832_v2  ;;  %v851_v16 = vmul.f32 %v1066_v29, %v849_v1 }
 0x47d   :  { %v844_v5 = vmul.f32 %v1067_v23, %v842_v40  ;;  %v848_v6 = vmul.f32 %v846_v3, %v842_v40  ;;  %v853_v44 = vadd.f32 %v1068_v10, %v851_v16 }
 0x47f   :  { %v850_v31 = vadd.f32 %v1486_v20, %v848_v6  ;;  %862 = vperm.xlu1 %1100, %v844_v5  }
 0x481   :  { %871 = vperm.xlu2 %1102, %v853_v44   ;;  %v852_v22 = vmul.f32 %v1067_v23, %v850_v31 }
 0x483   :  { %v854_v8 = vadd.f32 %v1069_v7, %v852_v22 }
 0x487   :  { %876 = vperm.xlu1 %1100, %v854_v8  }
 0x4d3   :  { %v858_v39 = vpop.permute.xlu2 %857 }
 0x4d4   :  { %v865_v9 = vmul.f32 %v858_v39, %v1447_v56  ;;  %v866_v11 = vmul.f32 %v858_v39, %v1449_v57 }
 0x4db   :  { %v872_v53 = vpop.permute.xlu2 %871 }
 0x4dc   :  { %v879_v12 = vadd.f32 %v872_v53, %v865_v9  ;;  %v880_v54 = vadd.f32 %v872_v53, %v866_v11 }
 0x4de   :  { %v883_v13 = vsub.f32 0.0, %v879_v12  ;;  %v884_v14 = vsub.f32 0.0, %v880_v54 }
 0x4e0   :  { %v887_v20 = vmul.f32 1.442695, %v883_v13  ;;  %v889_v15 = vmul.f32 1.442695, %v884_v14 }
 0x4e2   :  { %1123 = vpow2.f32 %v887_v20 }
 0x4e3   :  { %1125 = vpow2.f32 %v889_v15 }
 0x4e8   :  { %v1124_v17 = vpop.eup %1123 }
 0x4e9   :  { %v1126_v18 = vpop.eup %1125  ;;  %v895_v62 = vadd.f32 1.0, %v1124_v17 }
 0x4ea   :  { %v896_v63 = vadd.f32 1.0, %v1126_v18 }
 0x4eb   :  { %1127 = vrcp.f32 %v895_v62 }
 0x4ec   :  { %1129 = vrcp.f32 %v896_v63 }
 0x4f1   :  { %v1128_v19 = vpop.eup %1127  ;;  %v863_v21 = vpop.permute.xlu1 %862 }
 0x4f2   :  { %v1130_v56 = vpop.eup %1129  ;;  %v903_v26 = vmul.f32 %v1128_v19, %v879_v12  ;;  %v867_v27 = vmul.f32 %v863_v21, %v1453_v0  ;;  %v868_v28 = vmul.f32 %v863_v21, %v1455_v4 }
 0x4f3   :  { %v904_v57 = vmul.f32 %v1130_v56, %v880_v54 }
 0x4f4   :  { %908 = vst [vmem:[#allocation3 + $0x20] sm:$0xff] %v903_v26 }
 0x4f5   :  { %909 = vst [vmem:[#allocation3 + $0x28] sm:$0xff] %v904_v57 }
 0x4f9   :  { %v877_v30 = vpop.permute.xlu1 %876 }
 0x4fa   :  { %v881_v32 = vadd.f32 %v877_v30, %v867_v27  ;;  %v882_v33 = vadd.f32 %v877_v30, %v868_v28 }
 0x4fc   :  { %v885_v34 = vsub.f32 0.0, %v881_v32  ;;  %v886_v36 = vsub.f32 0.0, %v882_v33 }
 0x4fe   :  { %v891_v37 = vmul.f32 1.442695, %v885_v34  ;;  %v893_v38 = vmul.f32 1.442695, %v886_v36 }
 0x500   :  { %1131 = vpow2.f32 %v891_v37 }
 0x501   :  { %1133 = vpow2.f32 %v893_v38 }
 0x506   :  { %v1132_v41 = vpop.eup %1131 }
 0x507   :  { %v1134_v42 = vpop.eup %1133  ;;  %v897_v43 = vadd.f32 1.0, %v1132_v41 }
 0x508   :  { %v898_v45 = vadd.f32 1.0, %v1134_v42 }
 0x509   :  { %1135 = vrcp.f32 %v897_v43 }
 0x50a   :  { %1137 = vrcp.f32 %v898_v45 }
 0x50f   :  { %v1136_v0 = vpop.eup %1135 }
 0x510   :  { %v1138_v4 = vpop.eup %1137  ;;  %v905_v46 = vmul.f32 %v1136_v0, %v881_v32 }
 0x511   :  { %v906_v47 = vmul.f32 %v1138_v4, %v882_v33 }
 0x512   :  { %910 = vst [vmem:[#allocation3 + $0x30] sm:$0xff] %v905_v46 }
 0x513   :  { %911 = vst [vmem:[#allocation3 + $0x38] sm:$0xff] %v906_v47 }
 0x514   :  { %924 = dma.vmem_to_hbm [thread:$0]  %s917_s8, 1024, %s919_s12, [#allocation4], %s1169_s13, %s1169_s13, %s1170_s1  }
 0x515   :  { %1163 = dma.done.wait [#allocation4], 1024  }
 0x516   :  { %1164 = vsyncadd [#allocation4], 4294966272 }
 0x517   :  { %929 = vsyncpa [#allocation4], 1 }

</bundles_post_ra>
